<compile_context>
chip_gen: v6e
topology: v6e:2x2x1
jax: 0.10.0
libtpu: 0.0.40
codegen_flags: <defaults>
</compile_context>

<pallas_src>
import functools
import math

import jax
import jax.numpy as jnp
from jax.experimental import pallas as pl
from jax.experimental.pallas import tpu as pltpu


def _round_up(a, m):
    return (a + m - 1) // m * m


def _largest_divisor(p, unit, cap):
    """Largest multiple of `unit` that divides `p` (p is a multiple of unit) and is <= cap."""
    cap = max(unit, min(cap, p))
    d = (cap // unit) * unit
    while p % d != 0:
        d -= unit
    return d


def _label_smoothing_kernel(x_ref, tgt_ref, loss_ref, *td_out, base, conf,
                            padding_idx, tile_v, write_td):
    j = pl.program_id(1)                      # vocab-tile index (reduction axis, last in grid)

    tgt = tgt_ref[...]                        # (tn, 1) int32 targets for this row tile
    tn = tgt.shape[0]
    tv = x_ref.shape[1]
    n_strips = tv // 128

    row_is_pad = tgt == padding_idx           # (tn, 1) bool, loop-invariant
    lane = jax.lax.broadcasted_iota(jnp.int32, (tn, 128), 1)   # loop-invariant 0..127
    tile_off = j * tile_v

    acc = jnp.zeros((tn, 128), jnp.float32)
    for g in range(n_strips):                 # 128-lane strips: small live working set
        off = tile_off + g * 128
        # Offsets folded into the scalar/(tn,1) side; iota stays constant.
        is_tgt = lane == (tgt - off)
        zero = (lane == (padding_idx - off)) | row_is_pad

        td = jnp.where(is_tgt, jnp.float32(conf), jnp.float32(base))
        td = jnp.where(zero, jnp.float32(0.0), td)
        if write_td:
            td_out[0][:, g * 128:(g + 1) * 128] = td.astype(td_out[0].dtype)

        x_strip = x_ref[:, g * 128:(g + 1) * 128].astype(jnp.float32)
        acc = acc + td * x_strip              # accumulate sum(td*x); constants added in wrapper

    # Reduce (tn, 128) -> (8, 128) with aligned static slices (VPU only, no XLU).
    acc8 = acc[0:8, :]
    for g in range(1, tn // 8):
        acc8 = acc8 + acc[g * 8:(g + 1) * 8, :]

    # Per-row-tile accumulator, resident across the V ("arbitrary", last) grid axis.
    @pl.when(j == 0)
    def _():
        loss_ref[...] = jnp.zeros_like(loss_ref)

    loss_ref[...] += acc8


def label_smoothing(x, target, *, size, padding_idx, smoothing,
                    tile_n=256, tile_v=4096, compute_true_dist=True):
    """x: (N, size) log-probs; target: (N,) int. Returns (loss, true_dist or None)."""
    n, v = x.shape
    assert v == size
    assert size > 2, "label smoothing requires size > 2 (smoothing / (size - 2))"

    # ---- minimal padding: only to (8, 128); tiles are then chosen as exact divisors ----
    n_pad = _round_up(n, 8)
    v_pad = _round_up(v, 128)
    pad_rows = n_pad - n
    pad_cols = v_pad - v

    # Keep >= 2 row tiles when possible so the "parallel" row axis can feed both
    # TensorCores on v7x.
    tn_cap = tile_n
    if n_pad >= 16:
        tn_cap = min(tn_cap, n_pad // 2)
    tn = _largest_divisor(n_pad, 8, tn_cap)
    tv = _largest_divisor(v_pad, 128, tile_v)
    n_row_tiles = n_pad // tn
    n_v_tiles = v_pad // tv

    # ---- inputs: pad only if needed (no-ops in the aligned case); keep x's native dtype ----
    x_in = x if (pad_rows == 0 and pad_cols == 0) else jnp.pad(x, ((0, pad_rows), (0, pad_cols)))
    t_col = target.astype(jnp.int32).reshape(n, 1)
    t_in = t_col if pad_rows == 0 else jnp.pad(t_col, ((0, pad_rows), (0, 0)),
                                               constant_values=padding_idx)

    base = smoothing / (size - 2)
    conf = 1.0 - smoothing
    c_base = base * math.log(base) if base > 0.0 else 0.0
    c_conf = conf * math.log(conf) if conf > 0.0 else 0.0

    td_dtype = x.dtype
    kernel = functools.partial(
        _label_smoothing_kernel,
        base=base, conf=conf, padding_idx=padding_idx, tile_v=tv,
        write_td=compute_true_dist,
    )

    out_shape = [jax.ShapeDtypeStruct((n_row_tiles * 8, 128), jnp.float32)]
    out_specs = [pl.BlockSpec((8, 128), lambda i, j: (i, 0))]        # resident over j
    if compute_true_dist:
        out_shape.append(jax.ShapeDtypeStruct((n_pad, v_pad), td_dtype))
        out_specs.append(pl.BlockSpec((tn, tv), lambda i, j: (i, j)))  # lane-dense store

    # Double-buffered footprint for the streamed tiles + a little margin.
    step_bytes = tn * tv * (jnp.dtype(x.dtype).itemsize
                            + (jnp.dtype(td_dtype).itemsize if compute_true_dist else 0))
    vmem_limit = int(min(96 << 20, max(32 << 20, 2 * step_bytes + (4 << 20))))

    outs = pl.pallas_call(
        kernel,
        out_shape=tuple(out_shape),
        grid_spec=pltpu.PrefetchScalarGridSpec(
            num_scalar_prefetch=0,
            grid=(n_row_tiles, n_v_tiles),                 # V (reduction) axis last
            in_specs=[
                pl.BlockSpec((tn, tv), lambda i, j: (i, j)),   # x tile (native dtype)
                pl.BlockSpec((tn, 1), lambda i, j: (i, 0)),    # targets for this row tile
            ],
            out_specs=tuple(out_specs),
        ),
        compiler_params=pltpu.CompilerParams(
            dimension_semantics=("parallel", "arbitrary"),
            vmem_limit_bytes=vmem_limit,
        ),
    )(x_in, t_in)

    loss_partials = outs[0] if compute_true_dist else outs[0]
    if compute_true_dist:
        loss_partials, td_p = outs
    else:
        (loss_partials,) = outs if isinstance(outs, tuple) else (outs,)

    # Closed-form sum(td * log(td)): (size-2) base columns + 1 conf column per valid row.
    num_valid = jnp.sum((target != padding_idx).astype(jnp.float32))
    const = num_valid * (c_conf + (size - 2) * c_base)
    loss = const - jnp.sum(loss_partials)

    if not compute_true_dist:
        return loss, None
    true_dist = td_p if (pad_rows == 0 and pad_cols == 0) else td_p[:n, :v]
    return loss, true_dist


def _reference(x, target, size, padding_idx, smoothing):
    base = smoothing / (size - 2)
    conf = 1.0 - smoothing
    col = jnp.arange(size)[None, :]
    t = target[:, None]
    td = jnp.full(x.shape, base, jnp.float32)
    td = jnp.where(col == t, conf, td)
    td = jnp.where(col == padding_idx, 0.0, td)
    td = jnp.where(t == padding_idx, 0.0, td)
    safe = jnp.where(td > 0, td, 1.0)
    loss = jnp.sum(jnp.where(td > 0, td * (jnp.log(safe) - x.astype(jnp.float32)), 0.0))
    return loss, td


if __name__ == "__main__":
    key = jax.random.PRNGKey(0)
    PADDING_IDX, SMOOTHING = 0, 0.1
    k1, k2, k3, k4, k5, k6 = jax.random.split(key, 6)

    # Case 1: tiny module-consistent shapes (V padded to 128, single grid step).
    SIZE1, N1 = 16, 8
    x1 = jax.nn.log_softmax(jax.random.normal(k1, (N1, SIZE1), dtype=jnp.float32), axis=-1)
    t1 = jax.random.randint(k2, (N1,), 0, SIZE1, dtype=jnp.int32).at[3].set(PADDING_IDX)
    loss1, td1 = label_smoothing(x1, t1, size=SIZE1, padding_idx=PADDING_IDX,
                                 smoothing=SMOOTHING)
    jax.block_until_ready((loss1, td1))
    ref_loss1, ref_td1 = _reference(x1, t1, SIZE1, PADDING_IDX, SMOOTHING)
    assert jnp.allclose(td1, ref_td1, atol=1e-6)
    assert jnp.allclose(loss1, ref_loss1, rtol=1e-5, atol=1e-5)

    # Case 2: shapes that divide (8,128) exactly -> no wrapper pad/slice copies,
    # real multi-tile grid (3 row tiles x 3 V tiles).
    SIZE2, N2 = 384, 24
    x2 = jax.nn.log_softmax(jax.random.normal(k3, (N2, SIZE2), dtype=jnp.float32), axis=-1)
    t2 = jax.random.randint(k4, (N2,), 0, SIZE2, dtype=jnp.int32).at[5].set(PADDING_IDX)
    loss2, td2 = label_smoothing(x2, t2, size=SIZE2, padding_idx=PADDING_IDX,
                                 smoothing=SMOOTHING, tile_n=8, tile_v=128)
    jax.block_until_ready((loss2, td2))
    ref_loss2, ref_td2 = _reference(x2, t2, SIZE2, PADDING_IDX, SMOOTHING)
    assert jnp.allclose(td2, ref_td2, atol=1e-6)
    assert jnp.allclose(loss2, ref_loss2, rtol=1e-5, atol=1e-5)

    # Case 3: ragged shapes (row + column padding) with a multi-tile grid,
    # plus the loss-only path (skips the true_dist writeback).
    SIZE3, N3 = 300, 20
    x3 = jax.nn.log_softmax(jax.random.normal(k5, (N3, SIZE3), dtype=jnp.float32), axis=-1)
    t3 = jax.random.randint(k6, (N3,), 0, SIZE3, dtype=jnp.int32).at[7].set(PADDING_IDX)
    loss3, td3 = label_smoothing(x3, t3, size=SIZE3, padding_idx=PADDING_IDX,
                                 smoothing=SMOOTHING, tile_n=16, tile_v=256)
    loss3b, _ = label_smoothing(x3, t3, size=SIZE3, padding_idx=PADDING_IDX,
                                smoothing=SMOOTHING, tile_n=16, tile_v=256,
                                compute_true_dist=False)
    jax.block_until_ready((loss3, td3, loss3b))
    ref_loss3, ref_td3 = _reference(x3, t3, SIZE3, PADDING_IDX, SMOOTHING)
    assert jnp.allclose(td3, ref_td3, atol=1e-6)
    assert jnp.allclose(loss3, ref_loss3, rtol=1e-5, atol=1e-5)
    assert jnp.allclose(loss3b, ref_loss3, rtol=1e-5, atol=1e-5)

    print("KERNEL_OK")
</pallas_src>

<mosaic_0001>
module attributes {stable_mosaic.version = 11 : i64} {
  func.func @_label_smoothing_kernel(%arg0: i32, %arg1: i32, %arg2: memref<8x128xf32, #tpu.memory_space<vmem>>, %arg3: memref<8x1xi32, #tpu.memory_space<vmem>>, %arg4: memref<8x128xf32, #tpu.memory_space<vmem>>, %arg5: memref<8x128xf32, #tpu.memory_space<vmem>>) attributes {dimension_semantics = [#tpu.dimension_semantics<parallel>, #tpu.dimension_semantics<arbitrary>], iteration_bounds = array<i64: 1, 1>, scalar_prefetch = 0 : i64, scratch_operands = 0 : i64, tpu.core_type = #tpu.core_type<tc>, window_params = [{transform_indices = @transform_0, window_bounds = array<i64: 8, 128>}, {transform_indices = @transform_1, window_bounds = array<i64: 8, 1>}, {transform_indices = @transform_2, window_bounds = array<i64: 8, 128>}, {transform_indices = @transform_3, window_bounds = array<i64: 8, 128>}]} {
    %c0 = arith.constant 0 : index
    %c0_0 = arith.constant 0 : index
    %0 = vector.load %arg3[%c0, %c0_0] : memref<8x1xi32, #tpu.memory_space<vmem>>, vector<8x1xi32>
    %c0_i32 = arith.constant 0 : i32
    %1 = vector.broadcast %c0_i32 : i32 to vector<8x1xi32>
    %2 = arith.cmpi eq, %0, %1 : vector<8x1xi32>
    %3 = tpu.iota {dimensions = array<i32: 1>} : vector<8x128xi32>
    %c128_i32 = arith.constant 128 : i32
    %4 = arith.muli %arg1, %c128_i32 : i32
    %cst = arith.constant 0.000000e+00 : f32
    %5 = vector.broadcast %cst : f32 to vector<8x128xf32>
    %c0_i32_1 = arith.constant 0 : i32
    %6 = arith.addi %4, %c0_i32_1 : i32
    %7 = vector.broadcast %6 : i32 to vector<8x1xi32>
    %8 = arith.subi %0, %7 : vector<8x1xi32>
    %9 = vector.broadcast %8 : vector<8x1xi32> to vector<8x128xi32>
    %10 = arith.cmpi eq, %3, %9 : vector<8x128xi32>
    %c0_i32_2 = arith.constant 0 : i32
    %11 = arith.subi %c0_i32_2, %6 : i32
    %12 = vector.broadcast %11 : i32 to vector<8x128xi32>
    %13 = arith.cmpi eq, %3, %12 : vector<8x128xi32>
    %14 = vector.broadcast %2 : vector<8x1xi1> to vector<8x128xi1>
    %15 = arith.ori %13, %14 : vector<8x128xi1>
    %cst_3 = arith.constant 0.899999976 : f32
    %cst_4 = arith.constant 0.00714285718 : f32
    %16 = vector.broadcast %cst_3 : f32 to vector<8x128xf32>
    %17 = vector.broadcast %cst_4 : f32 to vector<8x128xf32>
    %18 = arith.select %10, %16, %17 : vector<8x128xi1>, vector<8x128xf32>
    %cst_5 = arith.constant 0.000000e+00 : f32
    %19 = vector.broadcast %cst_5 : f32 to vector<8x128xf32>
    %20 = arith.select %15, %19, %18 : vector<8x128xi1>, vector<8x128xf32>
    %c0_6 = arith.constant 0 : index
    %c0_7 = arith.constant 0 : index
    %21 = vector.load %arg5[%c0_6, %c0_7] : memref<8x128xf32, #tpu.memory_space<vmem>>, vector<8x128xf32>
    tpu.vector_store %arg5[%c0_6, %c0_7], %20 {strides = array<i32>} : memref<8x128xf32, #tpu.memory_space<vmem>>, vector<8x128xf32>,
    %c0_8 = arith.constant 0 : index
    %c0_9 = arith.constant 0 : index
    %22 = vector.load %arg2[%c0_8, %c0_9] : memref<8x128xf32, #tpu.memory_space<vmem>>, vector<8x128xf32>
    %23 = arith.mulf %20, %22 : vector<8x128xf32>
    %24 = arith.addf %5, %23 : vector<8x128xf32>
    %c0_i32_10 = arith.constant 0 : i32
    %25 = arith.cmpi eq, %arg1, %c0_i32_10 : i32
    %26 = arith.extui %25 : i1 to i32
    %c0_i32_11 = arith.constant 0 : i32
    %27 = arith.cmpi ne, %26, %c0_i32_11 : i32
    scf.if %27 {
      %cst_16 = arith.constant 0.000000e+00 : f32
      %31 = vector.broadcast %cst_16 : f32 to vector<8x128xf32>
      %c0_17 = arith.constant 0 : index
      %c0_18 = arith.constant 0 : index
      %32 = vector.load %arg4[%c0_17, %c0_18] : memref<8x128xf32, #tpu.memory_space<vmem>>, vector<8x128xf32>
      tpu.vector_store %arg4[%c0_17, %c0_18], %31 {strides = array<i32>} : memref<8x128xf32, #tpu.memory_space<vmem>>, vector<8x128xf32>,
    } else {
    }
    %c0_12 = arith.constant 0 : index
    %c0_13 = arith.constant 0 : index
    %28 = vector.load %arg4[%c0_12, %c0_13] : memref<8x128xf32, #tpu.memory_space<vmem>>, vector<8x128xf32>
    %29 = arith.addf %28, %24 : vector<8x128xf32>
    %c0_14 = arith.constant 0 : index
    %c0_15 = arith.constant 0 : index
    %30 = vector.load %arg4[%c0_14, %c0_15] : memref<8x128xf32, #tpu.memory_space<vmem>>, vector<8x128xf32>
    tpu.vector_store %arg4[%c0_14, %c0_15], %29 {strides = array<i32>} : memref<8x128xf32, #tpu.memory_space<vmem>>, vector<8x128xf32>,
    return
  }
  func.func @transform_0(%arg0: i32, %arg1: i32) -> (i32, i32) {
    %c0_i32 = arith.constant 0 : i32
    return %arg0, %arg1 : i32, i32
  }
  func.func @transform_1(%arg0: i32, %arg1: i32) -> (i32, i32) {
    %c0_i32 = arith.constant 0 : i32
    %c0_i32_0 = arith.constant 0 : i32
    return %arg0, %c0_i32 : i32, i32
  }
  func.func @transform_2(%arg0: i32, %arg1: i32) -> (i32, i32) {
    %c0_i32 = arith.constant 0 : i32
    %c0_i32_0 = arith.constant 0 : i32
    return %arg0, %c0_i32 : i32, i32
  }
  func.func @transform_3(%arg0: i32, %arg1: i32) -> (i32, i32) {
    %c0_i32 = arith.constant 0 : i32
    return %arg0, %arg1 : i32, i32
  }
}

</mosaic_0001>

<bundles_post_ra>
// kernel: tpu_custom_call.1
= control target key start
LH: loop header
LB: loop body
LE: loop exit
PB: predicated region body
PF: predicated region fallthrough
CT: control target
= control target key end

     0   :  { %9 = vsyncpa [#allocation3], 0  ;;  %v127_v1 = vmov 0   ;;  %s163_s0 = inlined_call_operand.vmem [shape: f32[8,128], index: 0, kind: input, shape index: {}]   ;;  %s164_s1 = inlined_call_operand.vmem [shape: s32[8,1], index: 1, kind: input, shape index: {}]   ;;  %s165_s2 = inlined_call_operand.hbm [shape: f32[8,128], index: 2, kind: output, shape index: {0}]   ;;  %s166_s3 = inlined_call_operand.hbm [shape: f32[8,128], index: 3, kind: output, shape index: {1}]  }
   0x1   :  { %v15_v0 = vld [vmem:[%s164_s1] sm:$0xff]  ;;  %82 = vset.pattern.permute.xlu0 %v127_v1 }
   0x2   :  { %vm16_vm0 = vcmp.eq.s32.totalorder %v15_v0, 0 }
   0x3   :  { %10 = vsyncpa [#allocation5], 0  ;;  %23 = vperm.xlu0 %82, %v15_v0   ;;  %v29_v2 = vsel %vm16_vm0, 1, %v127_v1  ;;  %v17_v3 = vlaneseq  ;;  %s128_s14 = smov [#allocation4]   ;;  %v38_v7 = vld [vmem:[%s163_s0] sm:$0xff]  ;;  %s130_s1 = smov [#allocation2]  }
   0x4   :  { %s65_s15 = sshll.u32 %s128_s14, 4  ;;  %v129_v8 = vmov 0.007142857   ;;  %s55_s18 = sshll.u32 %s130_s1, 4  ;;  %s66_s15 = int_to_ptr.vmem [resolvable:$true] %s65_s15  ;;  %s56_s18 = int_to_ptr.vmem [resolvable:$true] %s55_s18 }
   0x5   :  { %v18_v4 = vand.u32 127, %v17_v3  ;;  %s83_s19 = scalar_lea.vmem %s66_s15, 128  ;;  %p88_p1 = scmp.lt.s32.totalorder %s66_s15, %s66_s15 }
   0x6   :  { %p84_p0 = scmp.ne.s32.totalorder %s66_s15, %s83_s19  ;;  %p89_p2 = scmp.lt.s32.totalorder %s83_s19, %s83_s19 }
   0x7   :  { %31 = vperm.xlu0 %82, %v29_v2   ;;  %vm28_vm2 = vcmp.eq.s32.totalorder %v18_v4, 0 }
   0x8   :  { %p90_p3 = por %p89_p2, %p88_p1 }
   0xa   :  { %p91_p4 = pnand %p90_p3, %p84_p0 }
  0x7e   :  { %v24_v5 = vpop.permute.xlu0 %23 }
  0x7f   :  { %vm25_vm1 = vcmp.eq.s32.totalorder %v18_v4, %v24_v5 }
  0x80   :  { %v35_v9 = vsel %vm25_vm1, 0.9, %v129_v8 }
  0x82   :  { %v32_v6 = vpop.permute.xlu0 %31 }
  0x83   :  { %vm33_vm3 = vcmp.eq.s32.totalorder %v32_v6, 1 }
  0x84   :  { %vm34_vm4 = vmor %vm28_vm2, %vm33_vm3 }
  0x85   :  { %v36_v10 = vsel %vm34_vm4, 0.0, %v35_v9 }
  0x86   :  { %v39_v11 = vmul.f32 %v38_v7, %v36_v10  ;;  %37 = vst [vmem:[#allocation4] sm:$0xff] %v36_v10 }
  0x87   :  { %94 = shalt.err (!%p91_p4)
}
  0x88   :  { %68 = dma.vmem_to_hbm [thread:$0]  %s66_s15, 128, %s166_s3, [#allocation5]   ;;  %48 = vst [vmem:[#allocation2] sm:$0xff] %v39_v11 }
  0x89   :  { %s103_s0 = scalar_lea.vmem %s56_s18, 128  ;;  %p108_p6 = scmp.lt.s32.totalorder %s56_s18, %s56_s18 }
  0x8a   :  { %p104_p5 = scmp.ne.s32.totalorder %s56_s18, %s103_s0  ;;  %p109_p7 = scmp.lt.s32.totalorder %s103_s0, %s103_s0 }
  0x8c   :  { %p110_p8 = por %p109_p7, %p108_p6 }
  0x8e   :  { %p111_p9 = pnand %p110_p8, %p104_p5 }
  0x90   :  { %114 = shalt.err (!%p111_p9)
}
  0x91   :  { %58 = dma.vmem_to_hbm [thread:$0]  %s56_s18, 128, %s165_s2, [#allocation3]  }
  0x92   :  { %123 = dma.done.wait [#allocation3], 128  }
  0x93   :  { %124 = vsyncadd [#allocation3], 4294967168 }
  0x94   :  { %125 = dma.done.wait [#allocation5], 128  }
  0x95   :  { %126 = vsyncadd [#allocation5], 4294967168 }
  0x96   :  { %75 = vsyncpa [#allocation3], 1 }
  0x97   :  { %76 = vsyncpa [#allocation5], 1 }

</bundles_post_ra>
